<compile_context>
chip_gen: v7x
topology: tpu7x:2x2x1
jax: 0.10.0
libtpu: 0.0.40
codegen_flags: <defaults>
</compile_context>

<pallas_src>
import functools

import jax
import jax.numpy as jnp
from jax.experimental import pallas as pl
from jax.experimental.pallas import tpu as pltpu


def _elu(x):
    # ELU(alpha=1): x if x > 0 else exp(x) - 1 (clamp exp arg for safety)
    return jnp.where(x > 0.0, x, jnp.exp(jnp.minimum(x, 0.0)) - 1.0)


def _round_up(a, b):
    return ((a + b - 1) // b) * b


# ---------------------------------------------------------------------------
# Kernel 1: HyperMLP hypernetwork.  All operands are small and live in VMEM.
# The final Linear layer is pre-split (host side) into a "weights" half and a
# "bias" half so the kernel writes two separately shaped, lane-dense outputs.
# ---------------------------------------------------------------------------
def _make_hyper_mlp_kernel(n_hidden):
    def kernel(*refs):
        g_ref = refs[0]
        w_out_ref, b_out_ref = refs[-2], refs[-1]
        p = refs[1:-2]   # [w0,b0, ..., w_{h-1},b_{h-1}, w_lastW,b_lastW, w_lastB,b_lastB]
        h = g_ref[...]
        for i in range(n_hidden):
            w, b = p[2 * i], p[2 * i + 1]
            h = _elu(jnp.dot(h, w[...], preferred_element_type=jnp.float32) + b[...])
        w_lw, b_lw, w_lb, b_lb = p[-4], p[-3], p[-2], p[-1]
        w_out_ref[...] = jnp.dot(h, w_lw[...], preferred_element_type=jnp.float32) + b_lw[...]
        b_out_ref[...] = jnp.dot(h, w_lb[...], preferred_element_type=jnp.float32) + b_lb[...]
    return kernel


# ---------------------------------------------------------------------------
# Kernel 2: locally-connected matmul + bias, all d nodes per step.
# Grid = (n_ens, n_tiles).  At t == 0 the per-ensemble weights [d, m1, m2] are
# packed into a block-diagonal (d*m1, d*m2) VMEM tile; every n-tile then does a
# single full-width matmul and a lane-dense (d*m2-wide) store.
# ---------------------------------------------------------------------------
def _lc_kernel(x_ref, w_ref, b_ref, o_ref, wbd_ref, *, d, m1, m2):
    t = pl.program_id(1)

    @pl.when(t == 0)
    def _():
        wbd_ref[...] = jnp.zeros_like(wbd_ref)
        for j in range(d):                      # static unroll, static slices
            wbd_ref[j * m1:(j + 1) * m1, j * m2:(j + 1) * m2] = w_ref[0, j]

    acc = jnp.dot(x_ref[0], wbd_ref[...], preferred_element_type=jnp.float32)
    o_ref[0] = (acc + b_ref[0]).astype(o_ref.dtype)


# ---------------------------------------------------------------------------
# Parameter init (mirrors the nn.Linear stack shapes of HyperMLP).
# ---------------------------------------------------------------------------
def init_hyper_mlp_params(key, num_linear, input_features, output_features,
                          hidden_dims=(64, 64, 64)):
    d, m1, m2 = num_linear, input_features, output_features
    total = d * m1 * m2 + d * m2
    full_dims = [d * d, *hidden_dims, total]
    params = []
    for i in range(len(full_dims) - 1):
        key, kw, kb = jax.random.split(key, 3)
        w = 0.1 * jax.random.normal(kw, (full_dims[i], full_dims[i + 1]), jnp.float32)
        b = 0.1 * jax.random.normal(kb, (1, full_dims[i + 1]), jnp.float32)
        params += [w, b]
    return tuple(params)


# ---------------------------------------------------------------------------
# Wrapper.
# ---------------------------------------------------------------------------
@functools.partial(jax.jit, static_argnames=("num_linear", "input_features",
                                             "output_features", "tile_n"))
def hyper_locally_connected(x, G, params, *, num_linear, input_features,
                            output_features, tile_n=256):
    """x: [n_ens, n, d, 1, m1], G: [n_ens, d, d] -> [n_ens, n, d, 1, m2]."""
    n_ens, n, d, _, m1 = x.shape
    m2 = output_features
    assert d == num_linear and m1 == input_features
    w_feats = d * m1 * m2

    # ---- Hyper net: G -> (W, B).  Runs entirely in f32 (parameter dtype),
    # matching the PyTorch module; only the locally-connected matmul uses the
    # activation dtype.  The last Linear is split so the outputs reshape for
    # free on the host (no HBM slice copies between the two pallas_calls).
    *hid_params, w_last, b_last = params
    w_lw, w_lb = w_last[:, :w_feats], w_last[:, w_feats:]
    b_lw, b_lb = b_last[:, :w_feats], b_last[:, w_feats:]
    n_hidden = len(hid_params) // 2

    g_flat = G.reshape(n_ens, d * d).astype(jnp.float32)
    vmem_spec = pl.BlockSpec(memory_space=pltpu.MemorySpace.VMEM)
    w_flat, b_flat = pl.pallas_call(
        _make_hyper_mlp_kernel(n_hidden),
        out_shape=(jax.ShapeDtypeStruct((n_ens, w_feats), jnp.float32),
                   jax.ShapeDtypeStruct((n_ens, d * m2), jnp.float32)),
        in_specs=[vmem_spec] * (1 + len(hid_params) + 4),
        out_specs=(vmem_spec, vmem_spec),
    )(g_flat, *hid_params, w_lw, b_lw, w_lb, b_lb)
    # TODO(synk): for very large d, tile the last Linear over output columns so
    # its weight matrix is streamed rather than fully VMEM-resident.

    W = w_flat.reshape(n_ens, d, m1, m2).astype(x.dtype)   # free reshape
    B = b_flat.reshape(n_ens, 1, d * m2)                   # free reshape (f32)

    # ---- Locally connected matmul + bias (lane-dense, no transposes) -------
    x3 = x.reshape(n_ens, n, d * m1)                       # free reshape
    n_tile = min(_round_up(tile_n, 8), _round_up(n, 8))
    n_pad = _round_up(n, n_tile)
    if n_pad != n:
        x3 = jnp.pad(x3, ((0, 0), (0, n_pad - n), (0, 0)))
    grid = (n_ens, n_pad // n_tile)

    itemsize = jnp.dtype(x.dtype).itemsize
    est_vmem = (2 * n_tile * d * m1 * itemsize      # x blocks (double buffered)
                + 2 * n_tile * d * m2 * itemsize    # out blocks
                + 2 * d * m1 * m2 * itemsize        # W block
                + 2 * d * m2 * 4                    # B block
                + d * m1 * d * m2 * itemsize)       # block-diagonal scratch
    vmem_limit = int(min(max(4 * est_vmem, 16 * 2**20), 48 * 2**20))

    cost = pl.CostEstimate(
        flops=2 * n_ens * n_pad * d * m1 * m2,
        transcendentals=0,
        bytes_accessed=(x3.size * itemsize + W.size * itemsize + B.size * 4
                        + n_ens * n_pad * d * m2 * itemsize))

    out3 = pl.pallas_call(
        functools.partial(_lc_kernel, d=d, m1=m1, m2=m2),
        out_shape=jax.ShapeDtypeStruct((n_ens, n_pad, d * m2), x.dtype),
        grid=grid,
        in_specs=[
            pl.BlockSpec((1, n_tile, d * m1), lambda e, t: (e, t, 0)),
            pl.BlockSpec((1, d, m1, m2), lambda e, t: (e, 0, 0, 0)),
            pl.BlockSpec((1, 1, d * m2), lambda e, t: (e, 0, 0)),
        ],
        out_specs=pl.BlockSpec((1, n_tile, d * m2), lambda e, t: (e, t, 0)),
        scratch_shapes=[pltpu.VMEM((d * m1, d * m2), x.dtype)],
        compiler_params=pltpu.CompilerParams(
            dimension_semantics=("parallel", "arbitrary"),
            vmem_limit_bytes=vmem_limit),
        cost_estimate=cost,
    )(x3, W, B)

    return out3[:, :n].reshape(n_ens, n, d, 1, m2)


# ---------------------------------------------------------------------------
# Pure-JAX reference (mirrors the PyTorch forward exactly) for validation.
# ---------------------------------------------------------------------------
def reference_forward(x, G, params, num_linear, input_features, output_features):
    n_ens = x.shape[0]
    d, m1, m2 = num_linear, input_features, output_features
    h = G.reshape(n_ens, -1).astype(jnp.float32)
    p = list(params)
    for i in range(0, len(p) - 2, 2):
        h = _elu(h @ p[i] + p[i + 1])
    h = h @ p[-2] + p[-1]
    w_feats = d * m1 * m2
    W = h[:, :w_feats].reshape(n_ens, d, m1, m2)
    B = h[:, w_feats:].reshape(n_ens, d, m2)
    out = jnp.matmul(x, W[:, None]) + B[:, None, :, None, :]
    return out.astype(x.dtype)


if __name__ == "__main__":
    # Small, deterministic example (n deliberately not a multiple of the tile
    # size to exercise the padding path; tile_n=32 gives a (2, 4) grid).
    n_ens, n, d, m1, m2 = 2, 100, 4, 8, 8
    hidden_dims = (32, 32, 32)

    key = jax.random.PRNGKey(0)
    kx, kg, kp = jax.random.split(key, 3)

    x = jax.random.normal(kx, (n_ens, n, d, 1, m1), jnp.float32)
    G = jax.random.normal(kg, (n_ens, d, d), jnp.float32)
    params = init_hyper_mlp_params(kp, d, m1, m2, hidden_dims)

    out = hyper_locally_connected(
        x, G, params, num_linear=d, input_features=m1, output_features=m2,
        tile_n=32)
    out = jax.block_until_ready(out)

    ref = reference_forward(x, G, params, d, m1, m2)
    assert out.shape == (n_ens, n, d, 1, m2), out.shape
    max_err = float(jnp.max(jnp.abs(out - ref)))
    assert jnp.allclose(out, ref, rtol=1e-4, atol=1e-4), max_err

    print("KERNEL_OK")
</pallas_src>

<mosaic_0001>
module attributes {stable_mosaic.version = 11 : i64} {
  func.func @kernel(%arg0: memref<2x16xf32, #tpu.memory_space<vmem>>, %arg1: memref<16x32xf32, #tpu.memory_space<vmem>>, %arg2: memref<1x32xf32, #tpu.memory_space<vmem>>, %arg3: memref<32x32xf32, #tpu.memory_space<vmem>>, %arg4: memref<1x32xf32, #tpu.memory_space<vmem>>, %arg5: memref<32x32xf32, #tpu.memory_space<vmem>>, %arg6: memref<1x32xf32, #tpu.memory_space<vmem>>, %arg7: memref<32x256xf32, #tpu.memory_space<vmem>>, %arg8: memref<1x256xf32, #tpu.memory_space<vmem>>, %arg9: memref<32x32xf32, #tpu.memory_space<vmem>>, %arg10: memref<1x32xf32, #tpu.memory_space<vmem>>, %arg11: memref<2x256xf32, #tpu.memory_space<vmem>>, %arg12: memref<2x32xf32, #tpu.memory_space<vmem>>) attributes {dimension_semantics = [], scalar_prefetch = 0 : i64, scratch_operands = 0 : i64, tpu.core_type = #tpu.core_type<tc>} {
    %c0 = arith.constant 0 : index
    %c0_0 = arith.constant 0 : index
    %0 = vector.load %arg0[%c0, %c0_0] : memref<2x16xf32, #tpu.memory_space<vmem>>, vector<2x16xf32>
    %c0_1 = arith.constant 0 : index
    %c0_2 = arith.constant 0 : index
    %1 = vector.load %arg1[%c0_1, %c0_2] : memref<16x32xf32, #tpu.memory_space<vmem>>, vector<16x32xf32>
    %cst = arith.constant dense<0.000000e+00> : vector<2x32xf32>
    %2 = tpu.matmul %0, %1, %cst {dimension_numbers = #tpu.dot_dimension_numbers<[1], [0], [0], [1], [0, 0, 1, 1], [], []>} : vector<2x16xf32>, vector<16x32xf32>, vector<2x32xf32> -> vector<2x32xf32>
    %c0_3 = arith.constant 0 : index
    %c0_4 = arith.constant 0 : index
    %3 = vector.load %arg2[%c0_3, %c0_4] : memref<1x32xf32, #tpu.memory_space<vmem>>, vector<1x32xf32>
    %4 = vector.broadcast %3 : vector<1x32xf32> to vector<2x32xf32>
    %5 = arith.addf %2, %4 : vector<2x32xf32>
    %cst_5 = arith.constant 0.000000e+00 : f32
    %6 = vector.broadcast %cst_5 : f32 to vector<2x32xf32>
    %7 = arith.cmpf ogt, %5, %6 : vector<2x32xf32>
    %cst_6 = arith.constant 0.000000e+00 : f32
    %8 = vector.broadcast %cst_6 : f32 to vector<2x32xf32>
    %9 = arith.minimumf %5, %8 : vector<2x32xf32>
    %10 = math.exp %9 : vector<2x32xf32>
    %cst_7 = arith.constant 1.000000e+00 : f32
    %11 = vector.broadcast %cst_7 : f32 to vector<2x32xf32>
    %12 = arith.subf %10, %11 : vector<2x32xf32>
    %13 = arith.select %7, %5, %12 : vector<2x32xi1>, vector<2x32xf32>
    %c0_8 = arith.constant 0 : index
    %c0_9 = arith.constant 0 : index
    %14 = vector.load %arg3[%c0_8, %c0_9] : memref<32x32xf32, #tpu.memory_space<vmem>>, vector<32x32xf32>
    %cst_10 = arith.constant dense<0.000000e+00> : vector<2x32xf32>
    %15 = tpu.matmul %13, %14, %cst_10 {dimension_numbers = #tpu.dot_dimension_numbers<[1], [0], [0], [1], [0, 0, 1, 1], [], []>} : vector<2x32xf32>, vector<32x32xf32>, vector<2x32xf32> -> vector<2x32xf32>
    %c0_11 = arith.constant 0 : index
    %c0_12 = arith.constant 0 : index
    %16 = vector.load %arg4[%c0_11, %c0_12] : memref<1x32xf32, #tpu.memory_space<vmem>>, vector<1x32xf32>
    %17 = vector.broadcast %16 : vector<1x32xf32> to vector<2x32xf32>
    %18 = arith.addf %15, %17 : vector<2x32xf32>
    %cst_13 = arith.constant 0.000000e+00 : f32
    %19 = vector.broadcast %cst_13 : f32 to vector<2x32xf32>
    %20 = arith.cmpf ogt, %18, %19 : vector<2x32xf32>
    %cst_14 = arith.constant 0.000000e+00 : f32
    %21 = vector.broadcast %cst_14 : f32 to vector<2x32xf32>
    %22 = arith.minimumf %18, %21 : vector<2x32xf32>
    %23 = math.exp %22 : vector<2x32xf32>
    %cst_15 = arith.constant 1.000000e+00 : f32
    %24 = vector.broadcast %cst_15 : f32 to vector<2x32xf32>
    %25 = arith.subf %23, %24 : vector<2x32xf32>
    %26 = arith.select %20, %18, %25 : vector<2x32xi1>, vector<2x32xf32>
    %c0_16 = arith.constant 0 : index
    %c0_17 = arith.constant 0 : index
    %27 = vector.load %arg5[%c0_16, %c0_17] : memref<32x32xf32, #tpu.memory_space<vmem>>, vector<32x32xf32>
    %cst_18 = arith.constant dense<0.000000e+00> : vector<2x32xf32>
    %28 = tpu.matmul %26, %27, %cst_18 {dimension_numbers = #tpu.dot_dimension_numbers<[1], [0], [0], [1], [0, 0, 1, 1], [], []>} : vector<2x32xf32>, vector<32x32xf32>, vector<2x32xf32> -> vector<2x32xf32>
    %c0_19 = arith.constant 0 : index
    %c0_20 = arith.constant 0 : index
    %29 = vector.load %arg6[%c0_19, %c0_20] : memref<1x32xf32, #tpu.memory_space<vmem>>, vector<1x32xf32>
    %30 = vector.broadcast %29 : vector<1x32xf32> to vector<2x32xf32>
    %31 = arith.addf %28, %30 : vector<2x32xf32>
    %cst_21 = arith.constant 0.000000e+00 : f32
    %32 = vector.broadcast %cst_21 : f32 to vector<2x32xf32>
    %33 = arith.cmpf ogt, %31, %32 : vector<2x32xf32>
    %cst_22 = arith.constant 0.000000e+00 : f32
    %34 = vector.broadcast %cst_22 : f32 to vector<2x32xf32>
    %35 = arith.minimumf %31, %34 : vector<2x32xf32>
    %36 = math.exp %35 : vector<2x32xf32>
    %cst_23 = arith.constant 1.000000e+00 : f32
    %37 = vector.broadcast %cst_23 : f32 to vector<2x32xf32>
    %38 = arith.subf %36, %37 : vector<2x32xf32>
    %39 = arith.select %33, %31, %38 : vector<2x32xi1>, vector<2x32xf32>
    %c0_24 = arith.constant 0 : index
    %c0_25 = arith.constant 0 : index
    %40 = vector.load %arg7[%c0_24, %c0_25] : memref<32x256xf32, #tpu.memory_space<vmem>>, vector<32x256xf32>
    %cst_26 = arith.constant dense<0.000000e+00> : vector<2x256xf32>
    %41 = tpu.matmul %39, %40, %cst_26 {dimension_numbers = #tpu.dot_dimension_numbers<[1], [0], [0], [1], [0, 0, 1, 1], [], []>} : vector<2x32xf32>, vector<32x256xf32>, vector<2x256xf32> -> vector<2x256xf32>
    %c0_27 = arith.constant 0 : index
    %c0_28 = arith.constant 0 : index
    %42 = vector.load %arg8[%c0_27, %c0_28] : memref<1x256xf32, #tpu.memory_space<vmem>>, vector<1x256xf32>
    %43 = vector.broadcast %42 : vector<1x256xf32> to vector<2x256xf32>
    %44 = arith.addf %41, %43 : vector<2x256xf32>
    %c0_29 = arith.constant 0 : index
    %c0_30 = arith.constant 0 : index
    %45 = vector.load %arg11[%c0_29, %c0_30] : memref<2x256xf32, #tpu.memory_space<vmem>>, vector<2x256xf32>
    tpu.vector_store %arg11[%c0_29, %c0_30], %44 {strides = array<i32>} : memref<2x256xf32, #tpu.memory_space<vmem>>, vector<2x256xf32>,
    %c0_31 = arith.constant 0 : index
    %c0_32 = arith.constant 0 : index
    %46 = vector.load %arg9[%c0_31, %c0_32] : memref<32x32xf32, #tpu.memory_space<vmem>>, vector<32x32xf32>
    %cst_33 = arith.constant dense<0.000000e+00> : vector<2x32xf32>
    %47 = tpu.matmul %39, %46, %cst_33 {dimension_numbers = #tpu.dot_dimension_numbers<[1], [0], [0], [1], [0, 0, 1, 1], [], []>} : vector<2x32xf32>, vector<32x32xf32>, vector<2x32xf32> -> vector<2x32xf32>
    %c0_34 = arith.constant 0 : index
    %c0_35 = arith.constant 0 : index
    %48 = vector.load %arg10[%c0_34, %c0_35] : memref<1x32xf32, #tpu.memory_space<vmem>>, vector<1x32xf32>
    %49 = vector.broadcast %48 : vector<1x32xf32> to vector<2x32xf32>
    %50 = arith.addf %47, %49 : vector<2x32xf32>
    %c0_36 = arith.constant 0 : index
    %c0_37 = arith.constant 0 : index
    %51 = vector.load %arg12[%c0_36, %c0_37] : memref<2x32xf32, #tpu.memory_space<vmem>>, vector<2x32xf32>
    tpu.vector_store %arg12[%c0_36, %c0_37], %50 {strides = array<i32>} : memref<2x32xf32, #tpu.memory_space<vmem>>, vector<2x32xf32>,
    return
  }
}

module attributes {stable_mosaic.version = 11 : i64} {
  func.func @_lc_kernel(%arg0: i32, %arg1: i32, %arg2: memref<1x32x32xf32, #tpu.memory_space<vmem>>, %arg3: memref<1x4x8x8xf32, #tpu.memory_space<vmem>>, %arg4: memref<1x1x32xf32, #tpu.memory_space<vmem>>, %arg5: memref<1x32x32xf32, #tpu.memory_space<vmem>>, %arg6: memref<32x32xf32, #tpu.memory_space<vmem>>) attributes {dimension_semantics = [#tpu.dimension_semantics<parallel>, #tpu.dimension_semantics<arbitrary>], iteration_bounds = array<i64: 2, 4>, scalar_prefetch = 0 : i64, scratch_operands = 1 : i64, tpu.core_type = #tpu.core_type<tc>, window_params = [{transform_indices = @transform_0, window_bounds = array<i64: 1, 32, 32>}, {transform_indices = @transform_1, window_bounds = array<i64: 1, 4, 8, 8>}, {transform_indices = @transform_2, window_bounds = array<i64: 1, 1, 32>}, {transform_indices = @transform_3, window_bounds = array<i64: 1, 32, 32>}]} {
    %c0_i32 = arith.constant 0 : i32
    %0 = arith.cmpi eq, %arg1, %c0_i32 : i32
    %1 = arith.extui %0 : i1 to i32
    %c0_i32_0 = arith.constant 0 : i32
    %2 = arith.cmpi ne, %1, %c0_i32_0 : i32
    scf.if %2 {
      %cst_11 = arith.constant 0.000000e+00 : f32
      %14 = vector.broadcast %cst_11 : f32 to vector<32x32xf32>
      %c0_12 = arith.constant 0 : index
      %c0_13 = arith.constant 0 : index
      %15 = vector.load %arg6[%c0_12, %c0_13] : memref<32x32xf32, #tpu.memory_space<vmem>>, vector<32x32xf32>
      tpu.vector_store %arg6[%c0_12, %c0_13], %14 {strides = array<i32>} : memref<32x32xf32, #tpu.memory_space<vmem>>, vector<32x32xf32>,
      %c0_14 = arith.constant 0 : index
      %c0_15 = arith.constant 0 : index
      %c0_16 = arith.constant 0 : index
      %c0_17 = arith.constant 0 : index
      %16 = vector.load %arg3[%c0_14, %c0_15, %c0_16, %c0_17] : memref<1x4x8x8xf32, #tpu.memory_space<vmem>>, vector<1x1x8x8xf32>
      %17 = vector.shape_cast %16 : vector<1x1x8x8xf32> to vector<8x8xf32>
      %c0_18 = arith.constant 0 : index
      %c0_19 = arith.constant 0 : index
      %18 = vector.load %arg6[%c0_18, %c0_19] : memref<32x32xf32, #tpu.memory_space<vmem>>, vector<8x8xf32>
      tpu.vector_store %arg6[%c0_18, %c0_19], %17 {strides = array<i32>} : memref<32x32xf32, #tpu.memory_space<vmem>>, vector<8x8xf32>,
      %c0_20 = arith.constant 0 : index
      %c1 = arith.constant 1 : index
      %c0_21 = arith.constant 0 : index
      %c0_22 = arith.constant 0 : index
      %19 = vector.load %arg3[%c0_20, %c1, %c0_21, %c0_22] : memref<1x4x8x8xf32, #tpu.memory_space<vmem>>, vector<1x1x8x8xf32>
      %20 = vector.shape_cast %19 : vector<1x1x8x8xf32> to vector<8x8xf32>
      %c8 = arith.constant 8 : index
      %c8_23 = arith.constant 8 : index
      %21 = vector.load %arg6[%c8, %c8_23] : memref<32x32xf32, #tpu.memory_space<vmem>>, vector<8x8xf32>
      tpu.vector_store %arg6[%c8, %c8_23], %20 {strides = array<i32>} : memref<32x32xf32, #tpu.memory_space<vmem>>, vector<8x8xf32>,
      %c0_24 = arith.constant 0 : index
      %c2 = arith.constant 2 : index
      %c0_25 = arith.constant 0 : index
      %c0_26 = arith.constant 0 : index
      %22 = vector.load %arg3[%c0_24, %c2, %c0_25, %c0_26] : memref<1x4x8x8xf32, #tpu.memory_space<vmem>>, vector<1x1x8x8xf32>
      %23 = vector.shape_cast %22 : vector<1x1x8x8xf32> to vector<8x8xf32>
      %c16 = arith.constant 16 : index
      %c16_27 = arith.constant 16 : index
      %24 = vector.load %arg6[%c16, %c16_27] : memref<32x32xf32, #tpu.memory_space<vmem>>, vector<8x8xf32>
      tpu.vector_store %arg6[%c16, %c16_27], %23 {strides = array<i32>} : memref<32x32xf32, #tpu.memory_space<vmem>>, vector<8x8xf32>,
      %c0_28 = arith.constant 0 : index
      %c3 = arith.constant 3 : index
      %c0_29 = arith.constant 0 : index
      %c0_30 = arith.constant 0 : index
      %25 = vector.load %arg3[%c0_28, %c3, %c0_29, %c0_30] : memref<1x4x8x8xf32, #tpu.memory_space<vmem>>, vector<1x1x8x8xf32>
      %26 = vector.shape_cast %25 : vector<1x1x8x8xf32> to vector<8x8xf32>
      %c24 = arith.constant 24 : index
      %c24_31 = arith.constant 24 : index
      %27 = vector.load %arg6[%c24, %c24_31] : memref<32x32xf32, #tpu.memory_space<vmem>>, vector<8x8xf32>
      tpu.vector_store %arg6[%c24, %c24_31], %26 {strides = array<i32>} : memref<32x32xf32, #tpu.memory_space<vmem>>, vector<8x8xf32>,
    } else {
    }
    %c0 = arith.constant 0 : index
    %c0_1 = arith.constant 0 : index
    %c0_2 = arith.constant 0 : index
    %3 = vector.load %arg2[%c0, %c0_1, %c0_2] : memref<1x32x32xf32, #tpu.memory_space<vmem>>, vector<1x32x32xf32>
    %4 = vector.shape_cast %3 : vector<1x32x32xf32> to vector<32x32xf32>
    %c0_3 = arith.constant 0 : index
    %c0_4 = arith.constant 0 : index
    %5 = vector.load %arg6[%c0_3, %c0_4] : memref<32x32xf32, #tpu.memory_space<vmem>>, vector<32x32xf32>
    %cst = arith.constant dense<0.000000e+00> : vector<32x32xf32>
    %6 = tpu.matmul %4, %5, %cst {dimension_numbers = #tpu.dot_dimension_numbers<[1], [0], [0], [1], [0, 0, 1, 1], [], []>} : vector<32x32xf32>, vector<32x32xf32>, vector<32x32xf32> -> vector<32x32xf32>
    %c0_5 = arith.constant 0 : index
    %c0_6 = arith.constant 0 : index
    %c0_7 = arith.constant 0 : index
    %7 = vector.load %arg4[%c0_5, %c0_6, %c0_7] : memref<1x1x32xf32, #tpu.memory_space<vmem>>, vector<1x1x32xf32>
    %8 = vector.shape_cast %7 : vector<1x1x32xf32> to vector<1x32xf32>
    %9 = vector.broadcast %8 : vector<1x32xf32> to vector<32x32xf32>
    %10 = arith.addf %6, %9 : vector<32x32xf32>
    %c0_8 = arith.constant 0 : index
    %c0_9 = arith.constant 0 : index
    %c0_10 = arith.constant 0 : index
    %11 = vector.load %arg5[%c0_8, %c0_9, %c0_10] : memref<1x32x32xf32, #tpu.memory_space<vmem>>, vector<1x32x32xf32>
    %12 = vector.shape_cast %11 : vector<1x32x32xf32> to vector<32x32xf32>
    %13 = vector.shape_cast %10 : vector<32x32xf32> to vector<1x32x32xf32>
    tpu.vector_store %arg5[%c0_8, %c0_9, %c0_10], %13 {strides = array<i32>} : memref<1x32x32xf32, #tpu.memory_space<vmem>>, vector<1x32x32xf32>,
    return
  }
  func.func @transform_0(%arg0: i32, %arg1: i32) -> (i32, i32, i32) {
    %c0_i32 = arith.constant 0 : i32
    %c0_i32_0 = arith.constant 0 : i32
    return %arg0, %arg1, %c0_i32 : i32, i32, i32
  }
  func.func @transform_1(%arg0: i32, %arg1: i32) -> (i32, i32, i32, i32) {
    %c0_i32 = arith.constant 0 : i32
    %c0_i32_0 = arith.constant 0 : i32
    %c0_i32_1 = arith.constant 0 : i32
    %c0_i32_2 = arith.constant 0 : i32
    return %arg0, %c0_i32, %c0_i32_0, %c0_i32_1 : i32, i32, i32, i32
  }
  func.func @transform_2(%arg0: i32, %arg1: i32) -> (i32, i32, i32) {
    %c0_i32 = arith.constant 0 : i32
    %c0_i32_0 = arith.constant 0 : i32
    %c0_i32_1 = arith.constant 0 : i32
    return %arg0, %c0_i32, %c0_i32_0 : i32, i32, i32
  }
  func.func @transform_3(%arg0: i32, %arg1: i32) -> (i32, i32, i32) {
    %c0_i32 = arith.constant 0 : i32
    %c0_i32_0 = arith.constant 0 : i32
    return %arg0, %arg1, %c0_i32 : i32, i32, i32
  }
}

</mosaic_0001>

<bundles_post_ra>
// kernel: hyper_locally_connected.2
= control target key start
LH: loop header
LB: loop body
LE: loop exit
PB: predicated region body
PF: predicated region fallthrough
CT: control target
= control target key end

     0   :  { %v617_v0 = vmov 0.0|0.0   ;;  %vm618_vm0 = vmmov 0   ;;  %v619_v3 = vmov 0.0   ;;  %vm50_vm1 = vcmask 130048   ;;  %s790_s1 = inlined_call_operand.vmem [shape: f32[16,32], index: 1, kind: input, shape index: {}]   ;;  %s791_s0 = inlined_call_operand.vmem [shape: f32[2,16], index: 0, kind: input, shape index: {}]   ;;  %s792_s3 = inlined_call_operand.vmem [shape: f32[32,32], index: 3, kind: input, shape index: {}]   ;;  %s793_s2 = inlined_call_operand.vmem [shape: f32[1,32], index: 2, kind: input, shape index: {}]   ;;  %s794_s5 = inlined_call_operand.vmem [shape: f32[32,32], index: 5, kind: input, shape index: {}]   ;;  %s795_s4 = inlined_call_operand.vmem [shape: f32[1,32], index: 4, kind: input, shape index: {}]   ;;  %s796_s7 = inlined_call_operand.vmem [shape: f32[32,256], index: 7, kind: input, shape index: {}]   ;;  %s797_s9 = inlined_call_operand.vmem [shape: f32[32,32], index: 9, kind: input, shape index: {}]   ;;  %s798_s6 = inlined_call_operand.vmem [shape: f32[1,32], index: 6, kind: input, shape index: {}]   ;;  %s799_s8 = inlined_call_operand.vmem [shape: f32[1,256], index: 8, kind: input, shape index: {}]   ;;  %s800_s10 = inlined_call_operand.vmem [shape: f32[1,32], index: 10, kind: input, shape index: {}]   ;;  %s801_s12 = inlined_call_operand.vmem [shape: f32[2,32], index: 12, kind: output, shape index: {1}]   ;;  %s802_s11 = inlined_call_operand.vmem [shape: f32[2,256], index: 11, kind: output, shape index: {0}]  }
   0x1   :  { %579 = vmatprep.subr.bf16.mxu0 %v617_v0  ;;  %v41_v1 = vld [vmem:[%s790_s1] sm:$0xff]  ;;  %v42_v2 = vld [vmem:[%s790_s1 + $0x8] sm:$0xff]  ;;  %543 = vmatprep.mubr.msk.f32.mxu0 %vm618_vm0, %v619_v3  ;;  %v132_v8 = vld [vmem:[%s792_s3 + $0x10] sm:$0xff]  ;;  %vm141_vm2 = vcmask 261120   ;;  %v321_v63 = vlaneseq  ;;  %vm498_vm6 = vcmask 254976  }
   0x2   :  { %v580_v4 = vpack.c.bf16 %v42_v2, %v41_v1  ;;  %582 = vmatprep.subr.bf16.mxu1 %v617_v0  ;;  %554 = vmatprep.mubr.msk.f32.mxu1 %vm618_vm0, %v619_v3  ;;  %v40_v5 = vld [vmem:[%s791_s0] sm:$0x3]  ;;  %v131_v7 = vld [vmem:[%s792_s3 + $0x8] sm:$0xff]  ;;  %v133_v10 = vld [vmem:[%s792_s3 + $0x18] sm:$0xff] }
   0x3   :  { %v130_v6 = vld [vmem:[%s792_s3] sm:$0xff]  ;;  %v586_v11 = vpack.c.bf16 %v133_v10, %v132_v8  ;;  %v222_v22 = vld [vmem:[%s794_s5 + $0x8] sm:$0xff]  ;;  %v223_v24 = vld [vmem:[%s794_s5 + $0x10] sm:$0xff] }
   0x4   :  { %581 = vmatpush3.bf16.msra.mxu0 %v580_v4  ;;  %v583_v9 = vpack.c.bf16 %v131_v7, %v130_v6  ;;  %v508_v12 = vld [vmem:[%s793_s2] ss:$0 sm:$0xff]  ;;  %v224_v25 = vld [vmem:[%s794_s5 + $0x18] sm:$0xff]  ;;  %v312_v36 = vld [vmem:[%s796_s7 + $0x8] sm:$0xff] }
   0x5   :  { %588 = vmatprep.subr.bf16.mxu0 %v617_v0  ;;  %v221_v21 = vld [vmem:[%s794_s5] sm:$0xff]  ;;  %v592_v26 = vpack.c.bf16 %v224_v25, %v223_v24  ;;  %v314_v37 = vld [vmem:[%s796_s7 + $0x18] sm:$0xff]  ;;  %v313_v40 = vld [vmem:[%s796_s7 + $0x10] sm:$0xff] }
   0x6   :  { %584 = vmatpush3.bf16.msra.mxu1 %v583_v9  ;;  %v589_v23 = vpack.c.bf16 %v222_v22, %v221_v21  ;;  %v511_v27 = vld [vmem:[%s795_s4] ss:$0 sm:$0xff]  ;;  %v594_v38 = vpack.c.bf16 %v314_v37, %v312_v36  ;;  %v418_v43 = vld [vmem:[%s797_s9 + $0x8] sm:$0xff]  ;;  %v318_v46 = vld [vmem:[%s796_s7 + $0x38] sm:$0xff] }
   0x7   :  { %544 = vmatmul.mubr.msk.f32.vlgmr.msra.gmra.mrb[0].mxu0 %vm50_vm1, %v40_v5  ;;  %585 = vmatprep.subr.bf16.mxu1 %v617_v0  ;;  %v311_v39 = vld [vmem:[%s796_s7] sm:$0xff]  ;;  %v316_v45 = vld [vmem:[%s796_s7 + $0x28] sm:$0xff]  ;;  %v317_v49 = vld [vmem:[%s796_s7 + $0x30] sm:$0xff] }
   0x8   :  { %565 = vmatprep.mubr.msk.f32.mxu0 %vm618_vm0, %v619_v3  ;;  %590 = vmatpush3.bf16.msra.mxu0 %v589_v23  ;;  %v417_v41 = vld [vmem:[%s797_s9] sm:$0xff]  ;;  %v596_v42 = vpack.c.bf16 %v313_v40, %v311_v39  ;;  %v598_v47 = vpack.c.bf16 %v318_v46, %v316_v45  ;;  %v419_v50 = vld [vmem:[%s797_s9 + $0x10] sm:$0xff]  ;;  %v420_v52 = vld [vmem:[%s797_s9 + $0x18] sm:$0xff] }
   0x9   :  { %591 = vmatprep.subr.bf16.mxu0 %v617_v0  ;;  %v603_v44 = vpack.c.bf16 %v418_v43, %v417_v41  ;;  %v315_v48 = vld [vmem:[%s796_s7 + $0x20] sm:$0xff]  ;;  %v606_v53 = vpack.c.bf16 %v420_v52, %v419_v50 }
   0xa   :  { %587 = vmatpush3.bf16.msra.mxu1 %v586_v11  ;;  %v600_v51 = vpack.c.bf16 %v317_v49, %v315_v48  ;;  %v514_v54 = vld [vmem:[%s798_s6] ss:$0 sm:$0xff] }
   0xb   :  { %595 = vmatprep.subr.bf16.mxu1 %v594_v38  ;;  %v319_v2 = vld [vmem:[%s799_s8] sm:$0x3] }
   0xc   :  { %593 = vmatpush3.bf16.msra.mxu0 %v592_v26  ;;  %v519_v5 = vld [vmem:[%s800_s10] ss:$0 sm:$0xff] }
   0xd   :  { %602 = vmatprep.subr.bf16.mxu0 %v617_v0 }
  0xda   :  { %v120_v13 = vpop.f32.mrb[0].mxu0 }
  0xdb   :  { %v121_v14 = vadd.f32 %v508_v12, %v120_v13  ;;  %v545_v15 = vpop.f32.mrb[1].mxu0 }
  0xdd   :  { %v125_v16 = vmin.f32 %v121_v14, 0.0  ;;  %vm124_vm3 = vcmp.gt.f32.partialorder %v121_v14, 0.0 }
  0xdf   :  { %v126_v17 = vmul.f32 1.442695, %v125_v16 }
  0xe1   :  { %611 = vpow2.f32 %v126_v17 }
  0xeb   :  { %v612_v18 = vpop.eup %611 }
  0xec   :  { %v510_v19 = vadd.f32 -1.0, %v612_v18 }
  0xee   :  { %v129_v20 = vsel %vm124_vm3, %v121_v14, %v510_v19 }
  0xef   :  { %555 = vmatmul.mubr.msk.f32.vlgmr.msra.gmra.mrb[0].mxu1 %vm141_vm2, %v129_v20 }
  0xf0   :  { %398 = vmatprep.mubr.f32.mxu1 %v619_v3  ;;  %597 = vmatpush1.bf16.msra.mxu1 %v596_v42 }
  0xf1   :  { %599 = vmatprep.subr.bf16.mxu1 %v598_v47 }
  0xf4   :  { %601 = vmatpush1.bf16.msra.mxu1 %v600_v51 }
 0x1c2   :  { %v211_v28 = vpop.f32.mrb[0].mxu1 }
 0x1c3   :  { %v212_v29 = vadd.f32 %v511_v27, %v211_v28  ;;  %v556_v30 = vpop.f32.mrb[1].mxu1 }
 0x1c5   :  { %v216_v31 = vmin.f32 %v212_v29, 0.0  ;;  %vm215_vm4 = vcmp.gt.f32.partialorder %v212_v29, 0.0 }
 0x1c7   :  { %v217_v32 = vmul.f32 1.442695, %v216_v31 }
 0x1c9   :  { %613 = vpow2.f32 %v217_v32 }
 0x1d3   :  { %v614_v33 = vpop.eup %613 }
 0x1d4   :  { %v513_v34 = vadd.f32 -1.0, %v614_v33 }
 0x1d6   :  { %v220_v35 = vsel %vm215_vm4, %v212_v29, %v513_v34 }
 0x1d7   :  { %566 = vmatmul.mubr.msk.f32.vlgmr.msra.gmra.mrb[2].mxu0 %vm141_vm2, %v220_v35 }
 0x1d8   :  { %576 = vmatprep.mubr.msk.f32.mxu0 %vm618_vm0, %v619_v3  ;;  %604 = vmatpush3.bf16.msra.mxu0 %v603_v44 }
 0x1d9   :  { %605 = vmatprep.subr.bf16.mxu0 %v617_v0  ;;  %v322_v0 = vshrl.u32 %v321_v63, 7 }
 0x1db   :  { %v323_v1 = vsub.s32 0, %v322_v0  ;;  %v327_v3 = vsub.s32 1, %v322_v0 }
 0x1dc   :  { %607 = vmatpush3.bf16.msra.mxu0 %v606_v53 }
 0x1dd   :  { %v324_v4 = vrot.slane %v319_v2, %v323_v1  ;;  %v328_v6 = vrot.slane %v319_v2, %v327_v3 }
 0x2aa   :  { %v301_v55 = vpop.f32.mrb[2].mxu0 }
 0x2ab   :  { %v302_v56 = vadd.f32 %v514_v54, %v301_v55  ;;  %v567_v57 = vpop.f32.mrb[3].mxu0 }
 0x2ad   :  { %v306_v58 = vmin.f32 %v302_v56, 0.0  ;;  %vm305_vm5 = vcmp.gt.f32.partialorder %v302_v56, 0.0 }
 0x2af   :  { %v307_v59 = vmul.f32 1.442695, %v306_v58 }
 0x2b1   :  { %615 = vpow2.f32 %v307_v59 }
 0x2bb   :  { %v616_v60 = vpop.eup %615 }
 0x2bc   :  { %v516_v61 = vadd.f32 -1.0, %v616_v60 }
 0x2be   :  { %v310_v62 = vsel %vm305_vm5, %v302_v56, %v516_v61 }
 0x2bf   :  { %517 = vmatmul.mubr.msk.f32.vlgmr.msra.gmra.mrb[2].mxu1 %vm141_vm2, %v310_v62  ;;  %577 = vmatmul.mubr.msk.f32.vlgmr.msra.gmra.mrb[4].mxu0 %vm141_vm2, %v310_v62 }
 0x392   :  { %v400_v7 = vpop.f32.mrb[2].mxu1  ;;  %v494_v8 = vpop.f32.mrb[4].mxu0 }
 0x393   :  { %v401_v9 = vadd.f32 %v400_v7, %v324_v4  ;;  %v495_v10 = vadd.f32 %v519_v5, %v494_v8  ;;  %v402_v11 = vpop.f32.mrb[3].mxu1  ;;  %v578_v12 = vpop.f32.mrb[5].mxu0 }
 0x394   :  { %v403_v13 = vadd.f32 %v402_v11, %v328_v6 }
 0x395   :  { %499 = vst.msk [vmem:[%s801_s12] sm:$0x3] %vm498_vm6, %v495_v10 }
 0x396   :  { %v407_v14 = vcombine.low %v401_v9, %v403_v13 }
 0x398   :  { %518 = vst.sshfl [vmem:[%s802_s11] sm:$0x33 pattern:$0x76325410] %v407_v14 }

// kernel: hyper_locally_connected.3
= control target key start
LH: loop header
LB: loop body
LE: loop exit
PB: predicated region body
PF: predicated region fallthrough
CT: control target
= control target key end

     0   :  { %s675_s12 = smov 0   ;;  %s677_s13 = smov 0   ;;  %s766_s0 = inlined_call_operand.vmem [shape: f32[2,128,32], index: 0, kind: input, shape index: {}]   ;;  %s767_s1 = inlined_call_operand.vmem [shape: f32[2,4,8,8], index: 1, kind: input, shape index: {}]   ;;  %s768_s2 = inlined_call_operand.vmem [shape: f32[2,1,32], index: 2, kind: input, shape index: {}]   ;;  %s769_s3 = inlined_call_operand.vmem [shape: f32[2,128,32], index: 3, kind: output, shape index: {}]  }
   0x1   :  { %s679_s14 = smov 0   ;;  %s681_s15 = smov 0  }
   0x2   :  { %s683_s16 = smov 0  }
   0x3 LB: > { %s22_s17 = sadd.s32 1, %s641_s14  ;;  %s25_s18 = sadd.s32 1, %s645_s15  ;;  %s649_s16 = sphi %s683_s16, %s13_s16   ;;  %s645_s15 = sphi %s681_s15, %s773_s15   ;;  %s641_s14 = sphi %s679_s14, %s772_s14   ;;  %s637_s13 = sphi %s677_s13, %s771_s13   ;;  %s633_s12 = sphi %s675_s12, %s770_s12  }
   0x4   : > { %p23_p0 = scmp.ge.s32.totalorder %s22_s17, 4  ;;  %p512_p1 = scmp.ge.s32.totalorder %s649_s16, 1 }
   0x5   : > { %p176_p2 = scmp.lt.s32.totalorder %s649_s16, 9 }
   0x6   : > { %s775_s17 = smov (%p23_p0, %s22_s17), 0  ;;  %s777_s18 = smov (!%p23_p0, %s25_s18), %s645_s15 }
   0x7   : > { %p177_p3 = pnand %p512_p1, %p176_p2  ;;  %p27_p4 = scmp.ge.s32.totalorder %s777_s18, 2 }
   0x8   : > { %s513_s19 = sshll.u32 (!%p177_p3), %s633_s12, 2  ;;  %p217_p5 = scmp.lt.s32.totalorder (!%p177_p3), %s637_s13, 1 }
   0x9   : > { %s779_s18 = smov (%p27_p4, %s777_s18), 0  ;;  %180 = sbr.rel (%p177_p3) target bundleno = 371 (0x173), region = 32 }
   0xa   : > { %p219_p6 = scmp.lt.s32.totalorder (!%p177_p3), %s513_s19, 15  ;;  %p521_p7 = scmp.ne.s32.totalorder (!%p177_p3), %s633_s12, 0 }
  0x10   : > { %s781_s13 = smov (!%p217_p5, %s637_s13), 1  ;;  %s783_s19 = smov (!%p219_p6, %s513_s19), 15 }
  0x11   : > { %s514_s20 = sshll.u32 %s781_s13, 4  ;;  %s532_s21 = sshll.u32 %s781_s13, 5  ;;  %vm248_vm0 = vcmask (!%p521_p7), 261120   ;;  %vm254_vm1 = vcmask (!%p521_p7), 64512   ;;  %v653_v4 = vmov (!%p521_p7), 0.0   ;;  %vm262_vm2 = vcmask (!%p521_p7), 130112  }
  0x12   : > { %s222_s22 = sadd.s32 %s514_s20, %s783_s19  ;;  %s230_s25 = scalar_lea.vmem %s767_s1, %s532_s21  ;;  %249 = vst.msk [vmem:[#allocation2] sm:$0xff] (!%p521_p7), %vm248_vm0, %v653_v4  ;;  %250 = vst.msk [vmem:[#allocation2 + $0x8] sm:$0xff] (!%p521_p7), %vm248_vm0, %v653_v4  ;;  %vm278_vm3 = vcmask (!%p521_p7), 261312   ;;  %vm270_vm4 = vcmask (!%p521_p7), 195712  }
  0x13   : > { %s515_s26 = sshll.u32 %s222_s22, 3  ;;  %s233_s29 = scalar_lea.vmem %s768_s2, %s781_s13  ;;  %v522_v0 = vld [vmem:[%s230_s25 + $0x8] sm:$0xff] (!%p521_p7)  ;;  %v524_v1 = vld [vmem:[%s230_s25 + $0x18] sm:$0xff] (!%p521_p7)  ;;  %v253_v2 = vld [vmem:[%s230_s25] sm:$0xff] (!%p521_p7)  ;;  %251 = vst.msk [vmem:[#allocation2 + $0x10] sm:$0xff] (!%p521_p7), %vm248_vm0, %v653_v4 }
  0x14   : > { %s722_s5 = scalar_lea.vmem %s766_s0, %s515_s26  ;;  %s727_s8 = scalar_lea.vmem %s769_s3, %s515_s26  ;;  %v523_v3 = vld [vmem:[%s230_s25 + $0x10] sm:$0xff] (!%p521_p7)  ;;  %252 = vst.msk [vmem:[#allocation2 + $0x18] sm:$0xff] (!%p521_p7), %vm248_vm0, %v653_v4 }
  0x15   : > { %247 = sbr.rel (%p521_p7) target bundleno = 142 (0x8e), region = 36  ;;  %s651_s9 = smov (!%p521_p7), 8   ;;  %255 = vst.msk [vmem:[#allocation2] sm:$0xff] (!%p521_p7), %vm254_vm1, %v253_v2 }
  0x16   : > { %259 = vrot.lane.b32.xlu0 (!%p521_p7), %v522_v0, %s651_s9  ;;  %s652_s10 = smov (!%p521_p7), 24   ;;  %s654_s11 = smov (!%p521_p7), 16  }
  0x17   : > { %275 = vrot.lane.b32.xlu1 (!%p521_p7), %v524_v1, %s652_s10 }
  0x1a   : > { %267 = vrot.lane.b32.xlu0 (!%p521_p7), %v523_v3, %s654_s11 }
  0x88   : > { %v260_v5 = vpop.permute.xlu0 %259 }
  0x89   : > { %v276_v6 = vpop.permute.xlu1 %275  ;;  %263 = vst.msk [vmem:[#allocation2 + $0x8] sm:$0xff] %vm262_vm2, %v260_v5 }
  0x8a   : > { %279 = vst.msk [vmem:[#allocation2 + $0x18] sm:$0xff] %vm278_vm3, %v276_v6 }
  0x8c   : > { %v268_v7 = vpop.permute.xlu0 %267 }
  0x8d   : > { %271 = vst.msk [vmem:[#allocation2 + $0x10] sm:$0xff] %vm270_vm4, %v268_v7 }
  0x8e PF: > { %v284_v8 = vld [vmem:[#allocation2] sm:$0xff]  ;;  %vm295_vm5 = vcmask 261120   ;;  %v282_v14 = vld [vmem:[%s722_s5 + $0x10] sm:$0xff]  ;;  %v281_v16 = vld [vmem:[%s722_s5 + $0x8] sm:$0xff] }
  0x8f   : > { %v280_v13 = vld [vmem:[%s722_s5] sm:$0xff]  ;;  %552 = vmatprep.mubr.msk.f32.mxu1 %vm295_vm5, %v282_v14  ;;  %v283_v17 = vld [vmem:[%s722_s5 + $0x18] sm:$0xff] }
  0x90   : > { %v285_v9 = vld [vmem:[#allocation2 + $0x8] sm:$0xff]  ;;  %549 = vmatprep.mubr.msk.f32.mxu0 %vm295_vm5, %v280_v13  ;;  %v525_v18 = vld [vmem:[%s233_s29] ss:$0 sm:$0xff] }
  0x91   : > { %v555_v11 = vpack.c.bf16 %v285_v9, %v284_v8  ;;  %v287_v12 = vld [vmem:[#allocation2 + $0x18] sm:$0xff] }
  0x93   : > { %556 = vmatprep.subr.bf16.mxu0 %v555_v11  ;;  %563 = vmatprep.subr.bf16.mxu1 %v555_v11 }
  0x94   : > { %v286_v10 = vld [vmem:[#allocation2 + $0x10] sm:$0xff]  ;;  %558 = vmatpush3.bf16.msra.mxu0 %v555_v11  ;;  %565 = vmatpush3.bf16.msra.mxu1 %v555_v11 }
  0x95   : > { %v559_v15 = vpack.c.bf16 %v287_v12, %v286_v10 }
  0x97   : > { %560 = vmatprep.subr.bf16.mxu0 %v559_v15  ;;  %564 = vmatprep.subr.bf16.mxu1 %v559_v15 }
  0x98   : > { %562 = vmatpush3.bf16.msra.mxu0 %v559_v15  ;;  %566 = vmatpush3.bf16.msra.mxu1 %v559_v15 }
  0x9b   : > { %550 = vmatmul.mubr.msk.f32.vlgmr.msra.gmra.mrb[0].mxu0 %vm295_vm5, %v281_v16  ;;  %553 = vmatmul.mubr.msk.f32.vlgmr.msra.gmra.mrb[0].mxu1 %vm295_vm5, %v283_v17 }
 0x16e   : > { %v551_v19 = vpop.f32.mrb[0].mxu0  ;;  %v554_v20 = vpop.f32.mrb[0].mxu1 }
 0x16f   : > { %v380_v21 = vadd.f32 %v551_v19, %v525_v18  ;;  %v390_v22 = vadd.f32 %v554_v20, %v525_v18  ;;  %v374_v23 = vpop.f32.mrb[1].mxu0  ;;  %v384_v24 = vpop.f32.mrb[1].mxu1 }
 0x170   : > { %v375_v25 = vadd.f32 %v525_v18, %v374_v23  ;;  %v385_v26 = vadd.f32 %v525_v18, %v384_v24 }
 0x171   : > { %394 = vst.msk [vmem:[%s727_s8 + $0x8] sm:$0xff] %vm295_vm5, %v380_v21  ;;  %396 = vst.msk [vmem:[%s727_s8 + $0x18] sm:$0xff] %vm295_vm5, %v390_v22 }
 0x172   : > { %393 = vst.msk [vmem:[%s727_s8] sm:$0xff] %vm295_vm5, %v375_v25  ;;  %395 = vst.msk [vmem:[%s727_s8 + $0x10] sm:$0xff] %vm295_vm5, %v385_v26 }
 0x173 PF: > { %s13_s16 = sadd.s32 1, %s649_s16   ;;  %s770_s12 = smov %s641_s14 }
 0x174   : > { %p10_p8 = scmp.ge.s32.totalorder %s13_s16, 10   ;;  %s771_s13 = smov %s645_s15 }
 0x175   : > { %s772_s14 = smov %s775_s17  ;;  %s773_s15 = smov %s779_s18 }
 0x176   :  { %12 = sbr.rel (!%p10_p8) target bundleno = 3 (0x3), region = 75 }

</bundles_post_ra>
